<compile_context>
chip_gen: v5e
topology: v5e:2x2
jax: 0.10.0
libtpu: 0.0.40
codegen_flags: <defaults>
</compile_context>

<pallas_src>
import jax
import jax.numpy as jnp
from jax.experimental import pallas as pl
from jax.experimental.pallas import tpu as pltpu

_LANE = 128
_SUBLANE = 8


def _round_up(n, m):
    return ((n + m - 1) // m) * m


def _concept2clip_kernel(x_ref, w1_ref, b1_ref, w2_ref, b2_ref, w3_ref, b3_ref, o_ref):
    """One batch tile of the 3-layer MLP. Weights/biases stay resident in VMEM."""
    x = x_ref[...]                                                        # (TB, Din_p) bf16

    h = jnp.dot(x, w1_ref[...], preferred_element_type=jnp.float32)      # MXU, f32 acc
    h = jnp.maximum(h + b1_ref[...], 0.0)                                 # bias + ReLU (VPU)

    h = jnp.dot(h.astype(jnp.bfloat16), w2_ref[...],
                preferred_element_type=jnp.float32)
    h = jnp.maximum(h + b2_ref[...], 0.0)

    out = jnp.dot(h.astype(jnp.bfloat16), w3_ref[...],
                  preferred_element_type=jnp.float32)
    o_ref[...] = (out + b3_ref[...]).astype(o_ref.dtype)                  # lane-dense store


def prepare_params(params):
    """Zero-pad every feature dim to a multiple of 128 lanes; cast matmul
    operands to bf16 (biases stay f32). Zero padding does not change the math."""
    w1, b1, w2, b2, w3, b3 = params
    d_in, hidden = w1.shape
    clip_dim = w3.shape[1]
    d_in_p = _round_up(d_in, _LANE)
    h_p = _round_up(hidden, _LANE)
    c_p = _round_up(clip_dim, _LANE)

    def pad2(a, rows, cols):
        return jnp.pad(a, ((0, rows - a.shape[0]), (0, cols - a.shape[1])))

    w1p = pad2(w1, d_in_p, h_p).astype(jnp.bfloat16)
    w2p = pad2(w2, h_p, h_p).astype(jnp.bfloat16)
    w3p = pad2(w3, h_p, c_p).astype(jnp.bfloat16)
    b1p = pad2(b1, 1, h_p)     # f32
    b2p = pad2(b2, 1, h_p)     # f32
    b3p = pad2(b3, 1, c_p)     # f32
    return (w1p, b1p, w2p, b2p, w3p, b3p)


def concept2clip_forward(x, params, *, block_b=512):
    """x: (B, n_concepts, 3, 3) float32. Returns (B, clip_dim) float32."""
    w1p, b1p, w2p, b2p, w3p, b3p = prepare_params(params)
    batch = x.shape[0]
    d_in = x.shape[1] * x.shape[2] * x.shape[3]
    d_in_p = w1p.shape[0]
    c_p = w3p.shape[1]
    clip_dim = params[5].shape[1]                       # unpadded output width

    # Batch tile: up to `block_b` rows (multiple of 8 sublanes); pad batch so the
    # grid divides evenly (padded rows are zeros and sliced off at the end).
    tb = max(_SUBLANE, min(block_b, _round_up(batch, _SUBLANE)))
    b_pad = _round_up(batch, tb)

    x2d = x.reshape(batch, d_in)
    x2d = jnp.pad(x2d, ((0, b_pad - batch), (0, d_in_p - d_in))).astype(jnp.bfloat16)

    grid = (b_pad // tb,)
    resident = lambda a: pl.BlockSpec(a.shape, lambda i: (0, 0))

    flops = 2 * b_pad * (d_in_p * w1p.shape[1]
                         + w2p.shape[0] * w2p.shape[1]
                         + w3p.shape[0] * c_p)
    bytes_accessed = (x2d.size * x2d.dtype.itemsize
                      + b_pad * c_p * 4
                      + sum(int(a.size) * a.dtype.itemsize
                            for a in (w1p, b1p, w2p, b2p, w3p, b3p)))

    out_padded = pl.pallas_call(
        _concept2clip_kernel,
        out_shape=jax.ShapeDtypeStruct((b_pad, c_p), jnp.float32),
        grid=grid,
        in_specs=[
            pl.BlockSpec((tb, d_in_p), lambda i: (i, 0)),   # x: tiled over batch
            resident(w1p), resident(b1p),                   # weights/biases resident
            resident(w2p), resident(b2p),
            resident(w3p), resident(b3p),
        ],
        out_specs=pl.BlockSpec((tb, c_p), lambda i: (i, 0)),
        compiler_params=pltpu.CompilerParams(
            dimension_semantics=("parallel",)),             # megacore on v7x
        cost_estimate=pl.CostEstimate(flops=flops, transcendentals=0,
                                      bytes_accessed=bytes_accessed),
    )(x2d, w1p, b1p, w2p, b2p, w3p, b3p)

    return out_padded[:batch, :clip_dim]


def init_params(key, n_concepts, clip_dim):
    """Deterministic synthetic init (PyTorch-ish uniform fan-in scaling).
    Weights stored as (in_features, out_features): transpose of nn.Linear layout."""
    d_in = n_concepts * 3 * 3
    hidden = (d_in + clip_dim) // 2
    dims = [(d_in, hidden), (hidden, hidden), (hidden, clip_dim)]
    params = []
    for i, (fi, fo) in enumerate(dims):
        kw, kb = jax.random.split(jax.random.fold_in(key, i))
        bound = 1.0 / jnp.sqrt(fi)
        w = jax.random.uniform(kw, (fi, fo), jnp.float32, -bound, bound)
        b = jax.random.uniform(kb, (1, fo), jnp.float32, -bound, bound)
        params += [w, b]
    return tuple(params)


def _reference_f32(x, params):
    """Pure-JAX f32 reference matching the PyTorch module exactly."""
    w1, b1, w2, b2, w3, b3 = params
    h = x.reshape(x.shape[0], -1)
    h = jnp.maximum(h @ w1 + b1, 0.0)
    h = jnp.maximum(h @ w2 + b2, 0.0)
    return h @ w3 + b3


def _reference_bf16(x, params):
    """Pure-JAX reference using the same bf16-operand / f32-accumulate path."""
    w1, b1, w2, b2, w3, b3 = params
    h = x.reshape(x.shape[0], -1).astype(jnp.bfloat16)
    h = jnp.dot(h, w1.astype(jnp.bfloat16), preferred_element_type=jnp.float32) + b1
    h = jnp.maximum(h, 0.0)
    h = jnp.dot(h.astype(jnp.bfloat16), w2.astype(jnp.bfloat16),
                preferred_element_type=jnp.float32) + b2
    h = jnp.maximum(h, 0.0)
    return jnp.dot(h.astype(jnp.bfloat16), w3.astype(jnp.bfloat16),
                   preferred_element_type=jnp.float32) + b3


if __name__ == "__main__":
    # Small shapes consistent with the module's forward.
    batch, n_concepts, clip_dim = 4, 16, 32      # d_in = 144, hidden = 88
    key = jax.random.PRNGKey(0)
    kx, kp = jax.random.split(key)

    x = jax.random.normal(kx, (batch, n_concepts, 3, 3), jnp.float32)
    params = init_params(kp, n_concepts, clip_dim)

    out = concept2clip_forward(x, params)
    out = jax.block_until_ready(out)

    assert out.shape == (batch, clip_dim)
    # Tight check against the same bf16/f32-acc numeric path.
    ref_bf16 = _reference_bf16(x, params)
    assert jnp.allclose(out, ref_bf16, atol=1e-2, rtol=1e-2)
    # Loose check against exact f32 PyTorch semantics (bf16 operand rounding only).
    ref_f32 = _reference_f32(x, params)
    assert jnp.allclose(out, ref_f32, atol=1e-1)

    print("KERNEL_OK")
</pallas_src>

<mosaic_0001>
module attributes {stable_mosaic.version = 11 : i64} {
  func.func @_concept2clip_kernel(%arg0: i32, %arg1: memref<8x256xbf16, #tpu.memory_space<vmem>>, %arg2: memref<256x128xbf16, #tpu.memory_space<vmem>>, %arg3: memref<1x128xf32, #tpu.memory_space<vmem>>, %arg4: memref<128x128xbf16, #tpu.memory_space<vmem>>, %arg5: memref<1x128xf32, #tpu.memory_space<vmem>>, %arg6: memref<128x128xbf16, #tpu.memory_space<vmem>>, %arg7: memref<1x128xf32, #tpu.memory_space<vmem>>, %arg8: memref<8x128xf32, #tpu.memory_space<vmem>>) attributes {dimension_semantics = [#tpu.dimension_semantics<parallel>], iteration_bounds = array<i64: 1>, scalar_prefetch = 0 : i64, scratch_operands = 0 : i64, tpu.core_type = #tpu.core_type<tc>, window_params = [{transform_indices = @transform_0, window_bounds = array<i64: 8, 256>}, {pipeline_mode = #tpu.pipeline_mode<synchronous>, transform_indices = @transform_1, window_bounds = array<i64: 256, 128>}, {pipeline_mode = #tpu.pipeline_mode<synchronous>, transform_indices = @transform_2, window_bounds = array<i64: 1, 128>}, {pipeline_mode = #tpu.pipeline_mode<synchronous>, transform_indices = @transform_3, window_bounds = array<i64: 128, 128>}, {pipeline_mode = #tpu.pipeline_mode<synchronous>, transform_indices = @transform_4, window_bounds = array<i64: 1, 128>}, {pipeline_mode = #tpu.pipeline_mode<synchronous>, transform_indices = @transform_5, window_bounds = array<i64: 128, 128>}, {pipeline_mode = #tpu.pipeline_mode<synchronous>, transform_indices = @transform_6, window_bounds = array<i64: 1, 128>}, {transform_indices = @transform_7, window_bounds = array<i64: 8, 128>}]} {
    %c0 = arith.constant 0 : index
    %c0_0 = arith.constant 0 : index
    %0 = vector.load %arg1[%c0, %c0_0] : memref<8x256xbf16, #tpu.memory_space<vmem>>, vector<8x256xbf16>
    %c0_1 = arith.constant 0 : index
    %c0_2 = arith.constant 0 : index
    %1 = vector.load %arg2[%c0_1, %c0_2] : memref<256x128xbf16, #tpu.memory_space<vmem>>, vector<256x128xbf16>
    %cst = arith.constant dense<0.000000e+00> : vector<8x128xf32>
    %2 = tpu.matmul %0, %1, %cst {dimension_numbers = #tpu.dot_dimension_numbers<[1], [0], [0], [1], [0, 0, 1, 1], [], []>} : vector<8x256xbf16>, vector<256x128xbf16>, vector<8x128xf32> -> vector<8x128xf32>
    %c0_3 = arith.constant 0 : index
    %c0_4 = arith.constant 0 : index
    %3 = vector.load %arg3[%c0_3, %c0_4] : memref<1x128xf32, #tpu.memory_space<vmem>>, vector<1x128xf32>
    %4 = vector.broadcast %3 : vector<1x128xf32> to vector<8x128xf32>
    %5 = arith.addf %2, %4 : vector<8x128xf32>
    %cst_5 = arith.constant 0.000000e+00 : f32
    %6 = vector.broadcast %cst_5 : f32 to vector<8x128xf32>
    %7 = arith.maximumf %5, %6 : vector<8x128xf32>
    %8 = arith.truncf %7 : vector<8x128xf32> to vector<8x128xbf16>
    %c0_6 = arith.constant 0 : index
    %c0_7 = arith.constant 0 : index
    %9 = vector.load %arg4[%c0_6, %c0_7] : memref<128x128xbf16, #tpu.memory_space<vmem>>, vector<128x128xbf16>
    %cst_8 = arith.constant dense<0.000000e+00> : vector<8x128xf32>
    %10 = tpu.matmul %8, %9, %cst_8 {dimension_numbers = #tpu.dot_dimension_numbers<[1], [0], [0], [1], [0, 0, 1, 1], [], []>} : vector<8x128xbf16>, vector<128x128xbf16>, vector<8x128xf32> -> vector<8x128xf32>
    %c0_9 = arith.constant 0 : index
    %c0_10 = arith.constant 0 : index
    %11 = vector.load %arg5[%c0_9, %c0_10] : memref<1x128xf32, #tpu.memory_space<vmem>>, vector<1x128xf32>
    %12 = vector.broadcast %11 : vector<1x128xf32> to vector<8x128xf32>
    %13 = arith.addf %10, %12 : vector<8x128xf32>
    %cst_11 = arith.constant 0.000000e+00 : f32
    %14 = vector.broadcast %cst_11 : f32 to vector<8x128xf32>
    %15 = arith.maximumf %13, %14 : vector<8x128xf32>
    %16 = arith.truncf %15 : vector<8x128xf32> to vector<8x128xbf16>
    %c0_12 = arith.constant 0 : index
    %c0_13 = arith.constant 0 : index
    %17 = vector.load %arg6[%c0_12, %c0_13] : memref<128x128xbf16, #tpu.memory_space<vmem>>, vector<128x128xbf16>
    %cst_14 = arith.constant dense<0.000000e+00> : vector<8x128xf32>
    %18 = tpu.matmul %16, %17, %cst_14 {dimension_numbers = #tpu.dot_dimension_numbers<[1], [0], [0], [1], [0, 0, 1, 1], [], []>} : vector<8x128xbf16>, vector<128x128xbf16>, vector<8x128xf32> -> vector<8x128xf32>
    %c0_15 = arith.constant 0 : index
    %c0_16 = arith.constant 0 : index
    %19 = vector.load %arg7[%c0_15, %c0_16] : memref<1x128xf32, #tpu.memory_space<vmem>>, vector<1x128xf32>
    %20 = vector.broadcast %19 : vector<1x128xf32> to vector<8x128xf32>
    %21 = arith.addf %18, %20 : vector<8x128xf32>
    %c0_17 = arith.constant 0 : index
    %c0_18 = arith.constant 0 : index
    %22 = vector.load %arg8[%c0_17, %c0_18] : memref<8x128xf32, #tpu.memory_space<vmem>>, vector<8x128xf32>
    tpu.vector_store %arg8[%c0_17, %c0_18], %21 {strides = array<i32>} : memref<8x128xf32, #tpu.memory_space<vmem>>, vector<8x128xf32>,
    return
  }
  func.func @transform_0(%arg0: i32) -> (i32, i32) {
    %c0_i32 = arith.constant 0 : i32
    %c0_i32_0 = arith.constant 0 : i32
    return %arg0, %c0_i32 : i32, i32
  }
  func.func @transform_1(%arg0: i32) -> (i32, i32) {
    %c0_i32 = arith.constant 0 : i32
    %c0_i32_0 = arith.constant 0 : i32
    %c0_i32_1 = arith.constant 0 : i32
    return %c0_i32, %c0_i32_0 : i32, i32
  }
  func.func @transform_2(%arg0: i32) -> (i32, i32) {
    %c0_i32 = arith.constant 0 : i32
    %c0_i32_0 = arith.constant 0 : i32
    %c0_i32_1 = arith.constant 0 : i32
    return %c0_i32, %c0_i32_0 : i32, i32
  }
  func.func @transform_3(%arg0: i32) -> (i32, i32) {
    %c0_i32 = arith.constant 0 : i32
    %c0_i32_0 = arith.constant 0 : i32
    %c0_i32_1 = arith.constant 0 : i32
    return %c0_i32, %c0_i32_0 : i32, i32
  }
  func.func @transform_4(%arg0: i32) -> (i32, i32) {
    %c0_i32 = arith.constant 0 : i32
    %c0_i32_0 = arith.constant 0 : i32
    %c0_i32_1 = arith.constant 0 : i32
    return %c0_i32, %c0_i32_0 : i32, i32
  }
  func.func @transform_5(%arg0: i32) -> (i32, i32) {
    %c0_i32 = arith.constant 0 : i32
    %c0_i32_0 = arith.constant 0 : i32
    %c0_i32_1 = arith.constant 0 : i32
    return %c0_i32, %c0_i32_0 : i32, i32
  }
  func.func @transform_6(%arg0: i32) -> (i32, i32) {
    %c0_i32 = arith.constant 0 : i32
    %c0_i32_0 = arith.constant 0 : i32
    %c0_i32_1 = arith.constant 0 : i32
    return %c0_i32, %c0_i32_0 : i32, i32
  }
  func.func @transform_7(%arg0: i32) -> (i32, i32) {
    %c0_i32 = arith.constant 0 : i32
    %c0_i32_0 = arith.constant 0 : i32
    return %arg0, %c0_i32 : i32, i32
  }
}

</mosaic_0001>

<bundles_post_ra>
// kernel: tpu_custom_call.1
= control target key start
LH: loop header
LB: loop body
LE: loop exit
PB: predicated region body
PF: predicated region fallthrough
CT: control target
= control target key end

     0   :  { %12 = vsyncpa [#allocation3], 0  ;;  %s809_s0 = inlined_call_operand.hbm [shape: bf16[8,256], index: 0, kind: input, shape index: {}]   ;;  %s810_s1 = inlined_call_operand.hbm [shape: bf16[256,128], index: 1, kind: input, shape index: {}]   ;;  %s811_s2 = inlined_call_operand.vmem [shape: f32[1,128], index: 2, kind: input, shape index: {}]   ;;  %s812_s3 = inlined_call_operand.hbm [shape: bf16[128,128], index: 3, kind: input, shape index: {}]   ;;  %s813_s4 = inlined_call_operand.vmem [shape: f32[1,128], index: 4, kind: input, shape index: {}]   ;;  %s814_s5 = inlined_call_operand.hbm [shape: bf16[128,128], index: 5, kind: input, shape index: {}]   ;;  %s815_s6 = inlined_call_operand.vmem [shape: f32[1,128], index: 6, kind: input, shape index: {}]   ;;  %s816_s7 = inlined_call_operand.hbm [shape: f32[8,128], index: 7, kind: output, shape index: {}]  }
   0x1   :  { %13 = vsyncpa [#allocation6], 0 }
   0x2   :  { %14 = vsyncpa [#allocation9], 0  ;;  %s31_s26 = sshll.u32 %s810_s1, 4  ;;  %s32_s26 = int_to_ptr.hbm [resolvable:$true] %s31_s26 }
   0x3   :  { %15 = vsyncpa [#allocation4], 0  ;;  %s738_s27 = smov [#allocation5]   ;;  %s21_s8 = sshll.u32 %s809_s0, 4  ;;  %s22_s8 = int_to_ptr.hbm [resolvable:$true] %s21_s8 }
   0x4   :  { %s33_s28 = sshll.u32 %s738_s27, 4  ;;  %s739_s9 = smov 64   ;;  %s34_s28 = int_to_ptr.vmem [resolvable:$true] %s33_s28 }
   0x5   :  { %s740_s10 = smov 4   ;;  %s741_s11 = smov [#allocation2]  }
   0x6   :  { %39 = dma.hbm_to_vmem [thread:$0]  %s32_s26, 2048, %s34_s28, [#allocation6], %s739_s9, %s739_s9, %s740_s10  }
   0x7   :  { %s23_s12 = sshll.u32 %s741_s11, 4  ;;  %s46_s15 = sshll.u32 %s812_s3, 4  ;;  %s24_s12 = int_to_ptr.vmem [resolvable:$true] %s23_s12  ;;  %s47_s15 = int_to_ptr.hbm [resolvable:$true] %s46_s15 }
   0x8   :  { %26 = dma.hbm_to_vmem [thread:$0]  %s22_s8, 128, %s24_s12, [#allocation3]  }
   0x9   :  { %s61_s17 = sshll.u32 %s814_s5, 4  ;;  %s742_s18 = smov [#allocation7]   ;;  %s62_s17 = int_to_ptr.hbm [resolvable:$true] %s61_s17 }
   0xa   :  { %s48_s19 = sshll.u32 %s742_s18, 4  ;;  %s743_s0 = smov [#allocation8]   ;;  %s49_s19 = int_to_ptr.vmem [resolvable:$true] %s48_s19 }
   0xb   :  { %54 = dma.hbm_to_vmem [thread:$0]  %s47_s15, 1024, %s49_s19, [#allocation6], %s739_s9, %s739_s9, %s740_s10  }
   0xc   :  { %s63_s20 = sshll.u32 %s743_s0, 4  ;;  %s64_s20 = int_to_ptr.vmem [resolvable:$true] %s63_s20 }
   0xd   :  { %69 = dma.hbm_to_vmem [thread:$0]  %s62_s17, 1024, %s64_s20, [#allocation9], %s739_s9, %s739_s9, %s740_s10  }
   0xe   :  { %730 = dma.done.wait [#allocation3], 128  }
   0xf   :  { %731 = vsyncadd [#allocation3], 4294967168 }
  0x10   :  { %732 = dma.done.wait [#allocation6], 3072  }
  0x11   :  { %733 = vsyncadd [#allocation6], 4294964224 }
  0x12   :  { %734 = dma.done.wait [#allocation9], 1024  }
  0x13   :  { %735 = vsyncadd [#allocation9], 4294966272  ;;  %v575_v0 = vld [vmem:[#allocation5 + $0x38] sm:$0xff]  ;;  %v574_v2 = vld [vmem:[#allocation5 + $0x30] sm:$0xff]  ;;  %s744_s24 = smov [#allocation10]   ;;  %s428_s28 = sshll.u32 %s816_s7, 4  ;;  %s429_s28 = int_to_ptr.hbm [resolvable:$true] %s428_s28 }
  0x14   :  { %v583_v1 = vld [vmem:[#allocation5 + $0x78] sm:$0xff]  ;;  %228 = vmatpush.bf16.msra.mxu0 %v575_v0  ;;  %v582_v3 = vld [vmem:[#allocation5 + $0x70] sm:$0xff]  ;;  %v573_v5 = vld [vmem:[#allocation5 + $0x28] sm:$0xff]  ;;  %s426_s25 = sshll.u32 %s744_s24, 4  ;;  %s427_s25 = int_to_ptr.vmem [resolvable:$true] %s426_s25 }
  0x15   :  { %241 = vmatpush.bf16.msra.mxu1 %v583_v1  ;;  %v591_v4 = vld [vmem:[#allocation7 + $0x38] sm:$0xff]  ;;  %v581_v6 = vld [vmem:[#allocation5 + $0x68] sm:$0xff]  ;;  %v590_v7 = vld [vmem:[#allocation7 + $0x30] sm:$0xff] }
  0x16   :  { %324 = vmatpush.bf16.msra.mxu2 %v591_v4  ;;  %v572_v8 = vld [vmem:[#allocation5 + $0x20] sm:$0xff]  ;;  %v589_v10 = vld [vmem:[#allocation7 + $0x28] sm:$0xff]  ;;  %v571_v11 = vld [vmem:[#allocation5 + $0x18] sm:$0xff] }
  0x17   :  { %v580_v9 = vld [vmem:[#allocation5 + $0x60] sm:$0xff]  ;;  %v579_v12 = vld [vmem:[#allocation5 + $0x58] sm:$0xff]  ;;  %v570_v14 = vld [vmem:[#allocation5 + $0x10] sm:$0xff] }
  0x18   :  { %229 = vmatpush.bf16.msra.mxu0 %v574_v2  ;;  %v588_v13 = vld [vmem:[#allocation7 + $0x20] sm:$0xff]  ;;  %v578_v15 = vld [vmem:[#allocation5 + $0x50] sm:$0xff]  ;;  %v587_v16 = vld [vmem:[#allocation7 + $0x18] sm:$0xff] }
  0x19   :  { %242 = vmatpush.bf16.msra.mxu1 %v582_v3  ;;  %v569_v17 = vld [vmem:[#allocation5 + $0x8] sm:$0xff]  ;;  %v88_v19 = vld [vmem:[#allocation2] sm:$0xff]  ;;  %v586_v20 = vld [vmem:[#allocation7 + $0x10] sm:$0xff] }
  0x1a   :  { %325 = vmatpush.bf16.msra.mxu2 %v590_v7  ;;  %v577_v18 = vld [vmem:[#allocation5 + $0x48] sm:$0xff]  ;;  %v126_v21 = vunpack.c.l.b16 %v88_v19  ;;  %v127_v22 = vunpack.c.h.b16 %v88_v19  ;;  %v568_v23 = vld [vmem:[#allocation5] sm:$0xff]  ;;  %v599_v29 = vld [vmem:[#allocation8 + $0x38] sm:$0xff] }
  0x1b   :  { %v576_v24 = vld [vmem:[#allocation5 + $0x40] sm:$0xff]  ;;  %v585_v27 = vld [vmem:[#allocation7 + $0x8] sm:$0xff]  ;;  %407 = vmatpush.bf16.msra.mxu3 %v599_v29  ;;  %v598_v30 = vld [vmem:[#allocation8 + $0x30] sm:$0xff] }
  0x1c   :  { %230 = vmatpush.bf16.msra.mxu0 %v573_v5  ;;  %v128_v25 = vpack.c.b16 %v126_v21, %v126_v21  ;;  %v129_v26 = vpack.c.b16 %v127_v22, %v127_v22  ;;  %v584_v28 = vld [vmem:[#allocation7] sm:$0xff]  ;;  %v597_v31 = vld [vmem:[#allocation8 + $0x28] sm:$0xff]  ;;  %v595_v33 = vld [vmem:[#allocation8 + $0x18] sm:$0xff] }
  0x1d   :  { %243 = vmatpush.bf16.msra.mxu1 %v581_v6  ;;  %v596_v32 = vld [vmem:[#allocation8 + $0x20] sm:$0xff]  ;;  %v594_v34 = vld [vmem:[#allocation8 + $0x10] sm:$0xff]  ;;  %v607_v35 = vld [vmem:[%s811_s2] ss:$0 sm:$0xff] }
  0x1e   :  { %326 = vmatpush.bf16.msra.mxu2 %v589_v10  ;;  %v593_v44 = vld [vmem:[#allocation8 + $0x8] sm:$0xff]  ;;  %v592_v45 = vld [vmem:[#allocation8] sm:$0xff]  ;;  %v608_v46 = vld [vmem:[%s813_s4] ss:$0 sm:$0xff] }
  0x1f   :  { %408 = vmatpush.bf16.msra.mxu3 %v598_v30  ;;  %v609_v52 = vld [vmem:[%s815_s6] ss:$0 sm:$0xff] }
  0x20   :  { %231 = vmatpush.bf16.msra.mxu0 %v572_v8 }
  0x21   :  { %244 = vmatpush.bf16.msra.mxu1 %v580_v9 }
  0x22   :  { %327 = vmatpush.bf16.msra.mxu2 %v588_v13 }
  0x23   :  { %409 = vmatpush.bf16.msra.mxu3 %v597_v31 }
  0x24   :  { %232 = vmatpush.bf16.msra.mxu0 %v571_v11 }
  0x25   :  { %245 = vmatpush.bf16.msra.mxu1 %v579_v12 }
  0x26   :  { %328 = vmatpush.bf16.msra.mxu2 %v587_v16 }
  0x27   :  { %410 = vmatpush.bf16.msra.mxu3 %v596_v32 }
  0x28   :  { %233 = vmatpush.bf16.msra.mxu0 %v570_v14 }
  0x29   :  { %246 = vmatpush.bf16.msra.mxu1 %v578_v15 }
  0x2a   :  { %329 = vmatpush.bf16.msra.mxu2 %v586_v20 }
  0x2b   :  { %411 = vmatpush.bf16.msra.mxu3 %v595_v33 }
  0x2c   :  { %234 = vmatpush.bf16.msra.mxu0 %v569_v17 }
  0x2d   :  { %247 = vmatpush.bf16.msra.mxu1 %v577_v18 }
  0x2e   :  { %330 = vmatpush.bf16.msra.mxu2 %v585_v27 }
  0x2f   :  { %412 = vmatpush.bf16.msra.mxu3 %v594_v34 }
  0x30   :  { %235 = vmatpush.bf16.msra.mxu0 %v568_v23 }
  0x31   :  { %248 = vmatpush.bf16.msra.mxu1 %v576_v24 }
  0x32   :  { %331 = vmatpush.bf16.msra.mxu2 %v584_v28 }
  0x33   :  { %236 = vmatmul.bf16.vlgmr.msra.gmra.mxu0 %v128_v25  ;;  %413 = vmatpush.bf16.msra.mxu3 %v593_v44 }
  0x34   :  { %249 = vmatmul.bf16.vlgmr.msra.gmra.mxu1 %v129_v26 }
  0x37   :  { %414 = vmatpush.bf16.msra.mxu3 %v592_v45 }
  0xb0   :  { %v237_v36 = vpop.f32.mrf.mxu0 }
  0xb1   :  { %v250_v37 = vpop.f32.mrf.mxu1  ;;  %v238_v38 = vadd.f32 %v607_v35, %v237_v36 }
  0xb3   :  { %v251_v39 = vadd.f32 %v250_v37, %v238_v38 }
  0xb5   :  { %v254_v40 = vmax.f32 %v251_v39, 0.0 }
  0xb7   :  { %v255_v41 = vpack.c.bf16 %v254_v40, %v254_v40 }
  0xb8   :  { %v239_v42 = vpop.f32.mrf.mxu0 }
  0xb9   :  { %v252_v43 = vpop.f32.mrf.mxu1  ;;  %332 = vmatmul.bf16.vlgmr.msra.gmra.mxu2 %v255_v41 }
 0x13c   :  { %v333_v47 = vpop.f32.mrf.mxu2 }
 0x13d   :  { %v334_v48 = vadd.f32 %v608_v46, %v333_v47 }
 0x13f   :  { %v337_v49 = vmax.f32 %v334_v48, 0.0 }
 0x141   :  { %v338_v50 = vpack.c.bf16 %v337_v49, %v337_v49 }
 0x143   :  { %415 = vmatmul.bf16.vlgmr.msra.gmra.mxu3 %v338_v50 }
 0x144   :  { %v335_v51 = vpop.f32.mrf.mxu2 }
 0x1c6   :  { %v416_v53 = vpop.f32.mrf.mxu3 }
 0x1c7   :  { %v417_v54 = vadd.f32 %v609_v52, %v416_v53 }
 0x1c9   :  { %420 = vst [vmem:[#allocation10] sm:$0xff] %v417_v54 }
 0x1ca   :  { %431 = dma.vmem_to_hbm [thread:$0]  %s427_s25, 128, %s429_s28, [#allocation4]  }
 0x1ce   :  { %v418_v55 = vpop.f32.mrf.mxu3 }
 0x1cf   :  { %736 = dma.done.wait [#allocation4], 128  }
 0x1d0   :  { %737 = vsyncadd [#allocation4], 4294967168 }
 0x1d1   :  { %436 = vsyncpa [#allocation3], 1 }
 0x1d2   :  { %437 = vsyncpa [#allocation6], 1 }
 0x1d3   :  { %438 = vsyncpa [#allocation9], 1 }
 0x1d4   :  { %439 = vsyncpa [#allocation4], 1 }

</bundles_post_ra>
